<compile_context>
chip_gen: v7x
topology: tpu7x:2x2x1
jax: 0.10.0
libtpu: 0.0.40
codegen_flags: <defaults>
</compile_context>

<pallas_src>
import functools

import jax
import jax.numpy as jnp
from jax.experimental import pallas as pl
from jax.experimental.pallas import tpu as pltpu


def _round_up(n, m):
    return ((n + m - 1) // m) * m


def mlp_kernel(x_ref,
               w1_ref, b1_ref,
               w2_ref, b2_ref,
               w3_ref, b3_ref,
               w4_ref, b4_ref,
               w5_ref, b5_ref,
               o_ref):
    # One (TB, 8) tile of x in, one (TB, 128) lane-dense tile of out.
    h = x_ref[...]  # already f32

    h = jnp.dot(h, w1_ref[...], preferred_element_type=jnp.float32) + b1_ref[...]
    h = jnp.maximum(h, 0.0)

    h = jnp.dot(h, w2_ref[...], preferred_element_type=jnp.float32) + b2_ref[...]
    h = jnp.maximum(h, 0.0)

    h = jnp.dot(h, w3_ref[...], preferred_element_type=jnp.float32) + b3_ref[...]
    h = jnp.maximum(h, 0.0)

    h = jnp.dot(h, w4_ref[...], preferred_element_type=jnp.float32) + b4_ref[...]
    h = jnp.maximum(h, 0.0)

    # Final layer is zero-padded to 128 output features -> lane-dense store.
    h = jnp.dot(h, w5_ref[...], preferred_element_type=jnp.float32) + b5_ref[...]

    o_ref[...] = h.astype(o_ref.dtype)


@functools.partial(jax.jit, static_argnames=("tb",))
def deep_nn_forward(x, params, *, tb=1024):
    """x: (B, 3) float32. params: list of (W, b) with W shaped (in, out)."""
    B = x.shape[0]
    in_dim = x.shape[1]                     # 3
    out_dim = params[-1][0].shape[1]        # 4

    # ---- pad K dim of x (3 -> 8, sublane aligned) with exact zeros ----------
    k_pad = 8
    x_p = jnp.zeros((B, k_pad), jnp.float32).at[:, :in_dim].set(x)

    # ---- pad batch to a whole number of TB-row tiles -------------------------
    tb_eff = min(tb, _round_up(B, 8))       # small B -> single small tile
    b_pad = _round_up(B, tb_eff)
    if b_pad != B:
        x_p = jnp.zeros((b_pad, k_pad), jnp.float32).at[:B, :].set(x_p)

    # ---- prepare (in, out) weights; pad W1 rows and W5/b5 columns ------------
    (w1, b1), (w2, b2), (w3, b3), (w4, b4), (w5, b5) = params

    w1_p = jnp.zeros((k_pad, w1.shape[1]), jnp.float32).at[:in_dim, :].set(w1)
    n_pad = 128                             # lane-dense output width
    w5_p = jnp.zeros((w5.shape[0], n_pad), jnp.float32).at[:, :out_dim].set(w5)
    b5_p = jnp.zeros((n_pad,), jnp.float32).at[:out_dim].set(b5)

    flat = [
        w1_p, b1.reshape(1, -1),
        w2,   b2.reshape(1, -1),
        w3,   b3.reshape(1, -1),
        w4,   b4.reshape(1, -1),
        w5_p, b5_p.reshape(1, -1),
    ]

    grid = (b_pad // tb_eff,)

    # x/out: streamed TB-row tiles. Weights/biases: resident (constant index_map).
    in_specs = [pl.BlockSpec((tb_eff, k_pad), lambda i: (i, 0))]
    in_specs += [pl.BlockSpec(w.shape, lambda i: (0, 0)) for w in flat]
    out_spec = pl.BlockSpec((tb_eff, n_pad), lambda i: (i, 0))

    out_padded = pl.pallas_call(
        mlp_kernel,
        out_shape=jax.ShapeDtypeStruct((b_pad, n_pad), jnp.float32),
        grid=grid,
        in_specs=in_specs,
        out_specs=out_spec,
        compiler_params=pltpu.CompilerParams(
            dimension_semantics=("parallel",),   # megacore sharding on v7x
        ),
    )(x_p, *flat)

    # Padding is exact zeros, so slicing reproduces the reference bit-for-bit.
    return out_padded[:B, :out_dim]


def init_params(key):
    """Deterministic init mimicking PyTorch nn.Linear default:
    U(-1/sqrt(fan_in), 1/sqrt(fan_in)) for both weight and bias."""
    dims = [(3, 64), (64, 128), (128, 64), (64, 32), (32, 4)]
    params = []
    for (fan_in, fan_out) in dims:
        key, kw, kb = jax.random.split(key, 3)
        bound = 1.0 / jnp.sqrt(jnp.float32(fan_in))
        w = jax.random.uniform(kw, (fan_in, fan_out), jnp.float32, -bound, bound)
        b = jax.random.uniform(kb, (fan_out,), jnp.float32, -bound, bound)
        params.append((w, b))
    return params


def reference_forward(x, params):
    h = x
    for i, (w, b) in enumerate(params):
        h = h @ w + b
        if i < len(params) - 1:
            h = jnp.maximum(h, 0.0)
    return h


if __name__ == "__main__":
    key = jax.random.PRNGKey(0)
    key, kx, kx2 = jax.random.split(key, 3)

    params = init_params(key)

    # Small batch (single small tile, grid=1).
    B = 8
    x = jax.random.normal(kx, (B, 3), jnp.float32)
    out = jax.block_until_ready(deep_nn_forward(x, params))
    ref = reference_forward(x, params)
    assert out.shape == (B, 4)
    assert jnp.allclose(out, ref, atol=1e-4, rtol=1e-4), "mismatch vs reference (B=8)"

    # Larger batch to exercise the streaming grid path (multiple TB tiles).
    B2 = 2048
    x2 = jax.random.normal(kx2, (B2, 3), jnp.float32)
    out2 = jax.block_until_ready(deep_nn_forward(x2, params))
    ref2 = reference_forward(x2, params)
    assert out2.shape == (B2, 4)
    assert jnp.allclose(out2, ref2, atol=1e-4, rtol=1e-4), "mismatch vs reference (B=2048)"

    print("KERNEL_OK")
</pallas_src>

<mosaic_0001>
module attributes {stable_mosaic.version = 11 : i64} {
  func.func @mlp_kernel(%arg0: i32, %arg1: memref<8x8xf32, #tpu.memory_space<vmem>>, %arg2: memref<8x64xf32, #tpu.memory_space<vmem>>, %arg3: memref<1x64xf32, #tpu.memory_space<vmem>>, %arg4: memref<64x128xf32, #tpu.memory_space<vmem>>, %arg5: memref<1x128xf32, #tpu.memory_space<vmem>>, %arg6: memref<128x64xf32, #tpu.memory_space<vmem>>, %arg7: memref<1x64xf32, #tpu.memory_space<vmem>>, %arg8: memref<64x32xf32, #tpu.memory_space<vmem>>, %arg9: memref<1x32xf32, #tpu.memory_space<vmem>>, %arg10: memref<32x128xf32, #tpu.memory_space<vmem>>, %arg11: memref<1x128xf32, #tpu.memory_space<vmem>>, %arg12: memref<8x128xf32, #tpu.memory_space<vmem>>) attributes {dimension_semantics = [#tpu.dimension_semantics<parallel>], iteration_bounds = array<i64: 1>, scalar_prefetch = 0 : i64, scratch_operands = 0 : i64, tpu.core_type = #tpu.core_type<tc>, window_params = [{transform_indices = @transform_0, window_bounds = array<i64: 8, 8>}, {pipeline_mode = #tpu.pipeline_mode<synchronous>, transform_indices = @transform_1, window_bounds = array<i64: 8, 64>}, {pipeline_mode = #tpu.pipeline_mode<synchronous>, transform_indices = @transform_2, window_bounds = array<i64: 1, 64>}, {pipeline_mode = #tpu.pipeline_mode<synchronous>, transform_indices = @transform_3, window_bounds = array<i64: 64, 128>}, {pipeline_mode = #tpu.pipeline_mode<synchronous>, transform_indices = @transform_4, window_bounds = array<i64: 1, 128>}, {pipeline_mode = #tpu.pipeline_mode<synchronous>, transform_indices = @transform_5, window_bounds = array<i64: 128, 64>}, {pipeline_mode = #tpu.pipeline_mode<synchronous>, transform_indices = @transform_6, window_bounds = array<i64: 1, 64>}, {pipeline_mode = #tpu.pipeline_mode<synchronous>, transform_indices = @transform_7, window_bounds = array<i64: 64, 32>}, {pipeline_mode = #tpu.pipeline_mode<synchronous>, transform_indices = @transform_8, window_bounds = array<i64: 1, 32>}, {pipeline_mode = #tpu.pipeline_mode<synchronous>, transform_indices = @transform_9, window_bounds = array<i64: 32, 128>}, {pipeline_mode = #tpu.pipeline_mode<synchronous>, transform_indices = @transform_10, window_bounds = array<i64: 1, 128>}, {transform_indices = @transform_11, window_bounds = array<i64: 8, 128>}]} {
    %c0 = arith.constant 0 : index
    %c0_0 = arith.constant 0 : index
    %0 = vector.load %arg1[%c0, %c0_0] : memref<8x8xf32, #tpu.memory_space<vmem>>, vector<8x8xf32>
    %c0_1 = arith.constant 0 : index
    %c0_2 = arith.constant 0 : index
    %1 = vector.load %arg2[%c0_1, %c0_2] : memref<8x64xf32, #tpu.memory_space<vmem>>, vector<8x64xf32>
    %cst = arith.constant dense<0.000000e+00> : vector<8x64xf32>
    %2 = tpu.matmul %0, %1, %cst {dimension_numbers = #tpu.dot_dimension_numbers<[1], [0], [0], [1], [0, 0, 1, 1], [], []>} : vector<8x8xf32>, vector<8x64xf32>, vector<8x64xf32> -> vector<8x64xf32>
    %c0_3 = arith.constant 0 : index
    %c0_4 = arith.constant 0 : index
    %3 = vector.load %arg3[%c0_3, %c0_4] : memref<1x64xf32, #tpu.memory_space<vmem>>, vector<1x64xf32>
    %4 = vector.broadcast %3 : vector<1x64xf32> to vector<8x64xf32>
    %5 = arith.addf %2, %4 : vector<8x64xf32>
    %cst_5 = arith.constant 0.000000e+00 : f32
    %6 = vector.broadcast %cst_5 : f32 to vector<8x64xf32>
    %7 = arith.maximumf %5, %6 : vector<8x64xf32>
    %c0_6 = arith.constant 0 : index
    %c0_7 = arith.constant 0 : index
    %8 = vector.load %arg4[%c0_6, %c0_7] : memref<64x128xf32, #tpu.memory_space<vmem>>, vector<64x128xf32>
    %cst_8 = arith.constant dense<0.000000e+00> : vector<8x128xf32>
    %9 = tpu.matmul %7, %8, %cst_8 {dimension_numbers = #tpu.dot_dimension_numbers<[1], [0], [0], [1], [0, 0, 1, 1], [], []>} : vector<8x64xf32>, vector<64x128xf32>, vector<8x128xf32> -> vector<8x128xf32>
    %c0_9 = arith.constant 0 : index
    %c0_10 = arith.constant 0 : index
    %10 = vector.load %arg5[%c0_9, %c0_10] : memref<1x128xf32, #tpu.memory_space<vmem>>, vector<1x128xf32>
    %11 = vector.broadcast %10 : vector<1x128xf32> to vector<8x128xf32>
    %12 = arith.addf %9, %11 : vector<8x128xf32>
    %cst_11 = arith.constant 0.000000e+00 : f32
    %13 = vector.broadcast %cst_11 : f32 to vector<8x128xf32>
    %14 = arith.maximumf %12, %13 : vector<8x128xf32>
    %c0_12 = arith.constant 0 : index
    %c0_13 = arith.constant 0 : index
    %15 = vector.load %arg6[%c0_12, %c0_13] : memref<128x64xf32, #tpu.memory_space<vmem>>, vector<128x64xf32>
    %cst_14 = arith.constant dense<0.000000e+00> : vector<8x64xf32>
    %16 = tpu.matmul %14, %15, %cst_14 {dimension_numbers = #tpu.dot_dimension_numbers<[1], [0], [0], [1], [0, 0, 1, 1], [], []>} : vector<8x128xf32>, vector<128x64xf32>, vector<8x64xf32> -> vector<8x64xf32>
    %c0_15 = arith.constant 0 : index
    %c0_16 = arith.constant 0 : index
    %17 = vector.load %arg7[%c0_15, %c0_16] : memref<1x64xf32, #tpu.memory_space<vmem>>, vector<1x64xf32>
    %18 = vector.broadcast %17 : vector<1x64xf32> to vector<8x64xf32>
    %19 = arith.addf %16, %18 : vector<8x64xf32>
    %cst_17 = arith.constant 0.000000e+00 : f32
    %20 = vector.broadcast %cst_17 : f32 to vector<8x64xf32>
    %21 = arith.maximumf %19, %20 : vector<8x64xf32>
    %c0_18 = arith.constant 0 : index
    %c0_19 = arith.constant 0 : index
    %22 = vector.load %arg8[%c0_18, %c0_19] : memref<64x32xf32, #tpu.memory_space<vmem>>, vector<64x32xf32>
    %cst_20 = arith.constant dense<0.000000e+00> : vector<8x32xf32>
    %23 = tpu.matmul %21, %22, %cst_20 {dimension_numbers = #tpu.dot_dimension_numbers<[1], [0], [0], [1], [0, 0, 1, 1], [], []>} : vector<8x64xf32>, vector<64x32xf32>, vector<8x32xf32> -> vector<8x32xf32>
    %c0_21 = arith.constant 0 : index
    %c0_22 = arith.constant 0 : index
    %24 = vector.load %arg9[%c0_21, %c0_22] : memref<1x32xf32, #tpu.memory_space<vmem>>, vector<1x32xf32>
    %25 = vector.broadcast %24 : vector<1x32xf32> to vector<8x32xf32>
    %26 = arith.addf %23, %25 : vector<8x32xf32>
    %cst_23 = arith.constant 0.000000e+00 : f32
    %27 = vector.broadcast %cst_23 : f32 to vector<8x32xf32>
    %28 = arith.maximumf %26, %27 : vector<8x32xf32>
    %c0_24 = arith.constant 0 : index
    %c0_25 = arith.constant 0 : index
    %29 = vector.load %arg10[%c0_24, %c0_25] : memref<32x128xf32, #tpu.memory_space<vmem>>, vector<32x128xf32>
    %cst_26 = arith.constant dense<0.000000e+00> : vector<8x128xf32>
    %30 = tpu.matmul %28, %29, %cst_26 {dimension_numbers = #tpu.dot_dimension_numbers<[1], [0], [0], [1], [0, 0, 1, 1], [], []>} : vector<8x32xf32>, vector<32x128xf32>, vector<8x128xf32> -> vector<8x128xf32>
    %c0_27 = arith.constant 0 : index
    %c0_28 = arith.constant 0 : index
    %31 = vector.load %arg11[%c0_27, %c0_28] : memref<1x128xf32, #tpu.memory_space<vmem>>, vector<1x128xf32>
    %32 = vector.broadcast %31 : vector<1x128xf32> to vector<8x128xf32>
    %33 = arith.addf %30, %32 : vector<8x128xf32>
    %c0_29 = arith.constant 0 : index
    %c0_30 = arith.constant 0 : index
    %34 = vector.load %arg12[%c0_29, %c0_30] : memref<8x128xf32, #tpu.memory_space<vmem>>, vector<8x128xf32>
    tpu.vector_store %arg12[%c0_29, %c0_30], %33 {strides = array<i32>} : memref<8x128xf32, #tpu.memory_space<vmem>>, vector<8x128xf32>,
    return
  }
  func.func @transform_0(%arg0: i32) -> (i32, i32) {
    %c0_i32 = arith.constant 0 : i32
    %c0_i32_0 = arith.constant 0 : i32
    return %arg0, %c0_i32 : i32, i32
  }
  func.func @transform_1(%arg0: i32) -> (i32, i32) {
    %c0_i32 = arith.constant 0 : i32
    %c0_i32_0 = arith.constant 0 : i32
    %c0_i32_1 = arith.constant 0 : i32
    return %c0_i32, %c0_i32_0 : i32, i32
  }
  func.func @transform_2(%arg0: i32) -> (i32, i32) {
    %c0_i32 = arith.constant 0 : i32
    %c0_i32_0 = arith.constant 0 : i32
    %c0_i32_1 = arith.constant 0 : i32
    return %c0_i32, %c0_i32_0 : i32, i32
  }
  func.func @transform_3(%arg0: i32) -> (i32, i32) {
    %c0_i32 = arith.constant 0 : i32
    %c0_i32_0 = arith.constant 0 : i32
    %c0_i32_1 = arith.constant 0 : i32
    return %c0_i32, %c0_i32_0 : i32, i32
  }
  func.func @transform_4(%arg0: i32) -> (i32, i32) {
    %c0_i32 = arith.constant 0 : i32
    %c0_i32_0 = arith.constant 0 : i32
    %c0_i32_1 = arith.constant 0 : i32
    return %c0_i32, %c0_i32_0 : i32, i32
  }
  func.func @transform_5(%arg0: i32) -> (i32, i32) {
    %c0_i32 = arith.constant 0 : i32
    %c0_i32_0 = arith.constant 0 : i32
    %c0_i32_1 = arith.constant 0 : i32
    return %c0_i32, %c0_i32_0 : i32, i32
  }
  func.func @transform_6(%arg0: i32) -> (i32, i32) {
    %c0_i32 = arith.constant 0 : i32
    %c0_i32_0 = arith.constant 0 : i32
    %c0_i32_1 = arith.constant 0 : i32
    return %c0_i32, %c0_i32_0 : i32, i32
  }
  func.func @transform_7(%arg0: i32) -> (i32, i32) {
    %c0_i32 = arith.constant 0 : i32
    %c0_i32_0 = arith.constant 0 : i32
    %c0_i32_1 = arith.constant 0 : i32
    return %c0_i32, %c0_i32_0 : i32, i32
  }
  func.func @transform_8(%arg0: i32) -> (i32, i32) {
    %c0_i32 = arith.constant 0 : i32
    %c0_i32_0 = arith.constant 0 : i32
    %c0_i32_1 = arith.constant 0 : i32
    return %c0_i32, %c0_i32_0 : i32, i32
  }
  func.func @transform_9(%arg0: i32) -> (i32, i32) {
    %c0_i32 = arith.constant 0 : i32
    %c0_i32_0 = arith.constant 0 : i32
    %c0_i32_1 = arith.constant 0 : i32
    return %c0_i32, %c0_i32_0 : i32, i32
  }
  func.func @transform_10(%arg0: i32) -> (i32, i32) {
    %c0_i32 = arith.constant 0 : i32
    %c0_i32_0 = arith.constant 0 : i32
    %c0_i32_1 = arith.constant 0 : i32
    return %c0_i32, %c0_i32_0 : i32, i32
  }
  func.func @transform_11(%arg0: i32) -> (i32, i32) {
    %c0_i32 = arith.constant 0 : i32
    %c0_i32_0 = arith.constant 0 : i32
    return %arg0, %c0_i32 : i32, i32
  }
}

</mosaic_0001>

<bundles_post_ra>
// kernel: deep_nn_forward.1
= control target key start
LH: loop header
LB: loop body
LE: loop exit
PB: predicated region body
PF: predicated region fallthrough
CT: control target
= control target key end

     0   :  { %vm47_vm0 = vcmask 64512   ;;  %v682_v0 = vmov 0.0   ;;  %vm683_vm1 = vmmov 0   ;;  %v684_v4 = vmov 0.0|0.0   ;;  %s908_s1 = inlined_call_operand.vmem [shape: f32[8,64], index: 1, kind: input, shape index: {}]   ;;  %s909_s0 = inlined_call_operand.vmem [shape: f32[8,8], index: 0, kind: input, shape index: {}]   ;;  %s910_s3 = inlined_call_operand.vmem [shape: f32[64,128], index: 3, kind: input, shape index: {}]   ;;  %s911_s5 = inlined_call_operand.vmem [shape: f32[128,64], index: 5, kind: input, shape index: {}]   ;;  %s912_s2 = inlined_call_operand.vmem [shape: f32[1,64], index: 2, kind: input, shape index: {}]   ;;  %s913_s7 = inlined_call_operand.vmem [shape: f32[64,32], index: 7, kind: input, shape index: {}]   ;;  %s914_s4 = inlined_call_operand.vmem [shape: f32[1,128], index: 4, kind: input, shape index: {}]   ;;  %s915_s6 = inlined_call_operand.vmem [shape: f32[1,64], index: 6, kind: input, shape index: {}]   ;;  %s916_s9 = inlined_call_operand.vmem [shape: f32[32,128], index: 9, kind: input, shape index: {}]   ;;  %s917_s8 = inlined_call_operand.vmem [shape: f32[1,32], index: 8, kind: input, shape index: {}]   ;;  %s918_s10 = inlined_call_operand.vmem [shape: f32[1,128], index: 10, kind: input, shape index: {}]   ;;  %s919_s11 = inlined_call_operand.vmem [shape: f32[8,128], index: 11, kind: output, shape index: {}]  }
   0x1   :  { %536 = vmatprep.subr.mxu0 %v682_v0  ;;  %v39_v1 = vld [vmem:[%s908_s1] sm:$0xff]  ;;  %538 = vmatprep.mubr.msk.f32.mxu0 %vm683_vm1, %v682_v0  ;;  %v123_v5 = vld [vmem:[%s910_s3 + $0x8] sm:$0xff]  ;;  %v124_v6 = vld [vmem:[%s910_s3 + $0x10] sm:$0xff]  ;;  %vm137_vm2 = vcmask 523264   ;;  %vm406_vm3 = vcmask 261120  }
   0x2   :  { %v38_v2 = vld [vmem:[%s909_s0] sm:$0xff]  ;;  %537 = vmatpush3.msra.mxu0 %v39_v1  ;;  %625 = vmatprep.subr.bf16.mxu1 %v684_v4  ;;  %v125_v7 = vld [vmem:[%s910_s3 + $0x18] sm:$0xff]  ;;  %v127_v11 = vld [vmem:[%s910_s3 + $0x28] sm:$0xff] }
   0x3   :  { %v122_v3 = vld [vmem:[%s910_s3] sm:$0xff]  ;;  %539 = vmatmul.mubr.msk.f32.vlgmr.msra.gmra.mrb[0].mxu0 %vm47_vm0, %v38_v2  ;;  %557 = vmatprep.mubr.msk.f32.mxu1 %vm683_vm1, %v682_v0  ;;  %v629_v9 = vpack.c.bf16 %v125_v7, %v124_v6  ;;  %v128_v13 = vld [vmem:[%s910_s3 + $0x30] sm:$0xff]  ;;  %v129_v14 = vld [vmem:[%s910_s3 + $0x38] sm:$0xff] }
   0x4   :  { %v626_v8 = vpack.c.bf16 %v123_v5, %v122_v3  ;;  %637 = vmatprep.subr.bf16.mxu0 %v684_v4  ;;  %592 = vmatprep.mubr.msk.f32.mxu0 %vm683_vm1, %v682_v0  ;;  %v126_v10 = vld [vmem:[%s910_s3 + $0x20] sm:$0xff]  ;;  %v635_v15 = vpack.c.bf16 %v129_v14, %v128_v13  ;;  %v213_v17 = vld [vmem:[%s911_s5 + $0x8] sm:$0xff]  ;;  %v214_v18 = vld [vmem:[%s911_s5 + $0x10] sm:$0xff] }
   0x5   :  { %v632_v12 = vpack.c.bf16 %v127_v11, %v126_v10  ;;  %v212_v16 = vld [vmem:[%s911_s5] sm:$0xff]  ;;  %v215_v20 = vld [vmem:[%s911_s5 + $0x18] sm:$0xff]  ;;  %v217_v23 = vld [vmem:[%s911_s5 + $0x28] sm:$0xff] }
   0x6   :  { %627 = vmatpush3.bf16.msra.mxu1 %v626_v8  ;;  %v638_v19 = vpack.c.bf16 %v213_v17, %v212_v16  ;;  %v641_v21 = vpack.c.bf16 %v215_v20, %v214_v18  ;;  %v216_v22 = vld [vmem:[%s911_s5 + $0x20] sm:$0xff]  ;;  %v218_v25 = vld [vmem:[%s911_s5 + $0x30] sm:$0xff]  ;;  %v219_v26 = vld [vmem:[%s911_s5 + $0x38] sm:$0xff] }
   0x7   :  { %628 = vmatprep.subr.bf16.mxu1 %v684_v4  ;;  %v644_v24 = vpack.c.bf16 %v217_v23, %v216_v22  ;;  %v647_v27 = vpack.c.bf16 %v219_v26, %v218_v25  ;;  %v220_v28 = vld [vmem:[%s911_s5 + $0x40] sm:$0xff]  ;;  %v221_v29 = vld [vmem:[%s911_s5 + $0x48] sm:$0xff]  ;;  %v222_v31 = vld [vmem:[%s911_s5 + $0x50] sm:$0xff] }
   0x8   :  { %639 = vmatpush3.bf16.msra.mxu0 %v638_v19  ;;  %v650_v30 = vpack.c.bf16 %v221_v29, %v220_v28  ;;  %v223_v32 = vld [vmem:[%s911_s5 + $0x58] sm:$0xff]  ;;  %v224_v34 = vld [vmem:[%s911_s5 + $0x60] sm:$0xff]  ;;  %v225_v35 = vld [vmem:[%s911_s5 + $0x68] sm:$0xff] }
   0x9   :  { %640 = vmatprep.subr.bf16.mxu0 %v684_v4  ;;  %v653_v33 = vpack.c.bf16 %v223_v32, %v222_v31  ;;  %v656_v36 = vpack.c.bf16 %v225_v35, %v224_v34  ;;  %v485_v37 = vld [vmem:[%s912_s2] ss:$0 sm:$0xff]  ;;  %v226_v42 = vld [vmem:[%s911_s5 + $0x70] sm:$0xff]  ;;  %v227_v43 = vld [vmem:[%s911_s5 + $0x78] sm:$0xff] }
   0xa   :  { %630 = vmatpush3.bf16.msra.mxu1 %v629_v9  ;;  %v659_v44 = vpack.c.bf16 %v227_v43, %v226_v42  ;;  %v306_v45 = vld [vmem:[%s913_s7] sm:$0xff]  ;;  %v307_v46 = vld [vmem:[%s913_s7 + $0x8] sm:$0xff]  ;;  %v308_v47 = vld [vmem:[%s913_s7 + $0x10] sm:$0xff] }
   0xb   :  { %631 = vmatprep.subr.bf16.mxu1 %v684_v4  ;;  %v662_v48 = vpack.c.bf16 %v307_v46, %v306_v45  ;;  %v309_v49 = vld [vmem:[%s913_s7 + $0x18] sm:$0xff]  ;;  %v310_v51 = vld [vmem:[%s913_s7 + $0x20] sm:$0xff]  ;;  %v311_v52 = vld [vmem:[%s913_s7 + $0x28] sm:$0xff] }
   0xc   :  { %642 = vmatpush3.bf16.msra.mxu0 %v641_v21  ;;  %v665_v50 = vpack.c.bf16 %v309_v49, %v308_v47  ;;  %v668_v53 = vpack.c.bf16 %v311_v52, %v310_v51  ;;  %v487_v54 = vld [vmem:[%s914_s4] ss:$0 sm:$0xff]  ;;  %v312_v59 = vld [vmem:[%s913_s7 + $0x30] sm:$0xff]  ;;  %v313_v60 = vld [vmem:[%s913_s7 + $0x38] sm:$0xff] }
   0xd   :  { %643 = vmatprep.subr.bf16.mxu0 %v684_v4  ;;  %v671_v61 = vpack.c.bf16 %v313_v60, %v312_v59  ;;  %v489_v62 = vld [vmem:[%s915_s6] ss:$0 sm:$0xff]  ;;  %v396_v1 = vld [vmem:[%s916_s9 + $0x8] sm:$0xff]  ;;  %v397_v8 = vld [vmem:[%s916_s9 + $0x10] sm:$0xff] }
   0xe   :  { %633 = vmatpush3.bf16.msra.mxu1 %v632_v12  ;;  %v395_v63 = vld [vmem:[%s916_s9] sm:$0xff]  ;;  %v398_v9 = vld [vmem:[%s916_s9 + $0x18] sm:$0xff] }
   0xf   :  { %634 = vmatprep.subr.bf16.mxu1 %v684_v4  ;;  %v674_v6 = vpack.c.bf16 %v396_v1, %v395_v63  ;;  %v677_v10 = vpack.c.bf16 %v398_v9, %v397_v8  ;;  %v490_v11 = vld [vmem:[%s917_s8] ss:$0 sm:$0xff] }
  0x10   :  { %645 = vmatpush3.bf16.msra.mxu0 %v644_v24 }
  0x11   :  { %646 = vmatprep.subr.bf16.mxu0 %v684_v4 }
  0x12   :  { %636 = vmatpush3.bf16.msra.mxu1 %v635_v15 }
  0x13   :  { %661 = vmatprep.subr.bf16.mxu1 %v684_v4 }
  0x14   :  { %648 = vmatpush3.bf16.msra.mxu0 %v647_v27 }
  0x15   :  { %649 = vmatprep.subr.bf16.mxu0 %v684_v4 }
  0x18   :  { %651 = vmatpush3.bf16.msra.mxu0 %v650_v30 }
  0x19   :  { %652 = vmatprep.subr.bf16.mxu0 %v684_v4 }
  0x1c   :  { %654 = vmatpush3.bf16.msra.mxu0 %v653_v33 }
  0x1d   :  { %655 = vmatprep.subr.bf16.mxu0 %v684_v4 }
  0x20   :  { %657 = vmatpush3.bf16.msra.mxu0 %v656_v36 }
  0x21   :  { %658 = vmatprep.subr.bf16.mxu0 %v684_v4 }
  0x24   :  { %660 = vmatpush3.bf16.msra.mxu0 %v659_v44 }
  0xd6   :  { %v117_v38 = vpop.f32.mrb[0].mxu0 }
  0xd7   :  { %v118_v39 = vadd.f32 %v485_v37, %v117_v38  ;;  %v540_v40 = vpop.f32.mrb[1].mxu0 }
  0xd9   :  { %v121_v41 = vmax.f32 %v118_v39, 0.0 }
  0xdb   :  { %558 = vmatmul.mubr.msk.f32.vlgmr.msra.gmra.mrb[0].mxu1 %vm137_vm2, %v121_v41 }
  0xdc   :  { %611 = vmatprep.mubr.msk.f32.mxu1 %vm683_vm1, %v682_v0  ;;  %663 = vmatpush3.bf16.msra.mxu1 %v662_v48 }
  0xdd   :  { %664 = vmatprep.subr.bf16.mxu1 %v684_v4 }
  0xe0   :  { %666 = vmatpush3.bf16.msra.mxu1 %v665_v50 }
  0xe1   :  { %667 = vmatprep.subr.bf16.mxu1 %v684_v4 }
  0xe4   :  { %669 = vmatpush3.bf16.msra.mxu1 %v668_v53 }
  0xe5   :  { %670 = vmatprep.subr.bf16.mxu1 %v684_v4 }
  0xe8   :  { %672 = vmatpush3.bf16.msra.mxu1 %v671_v61 }
  0xe9   :  { %673 = vmatprep.subr.bf16.mxu1 %v684_v4 }
 0x1ae   :  { %v207_v55 = vpop.f32.mrb[0].mxu1 }
 0x1af   :  { %v208_v56 = vadd.f32 %v487_v54, %v207_v55  ;;  %v559_v57 = vpop.f32.mrb[1].mxu1 }
 0x1b1   :  { %v211_v58 = vmax.f32 %v208_v56, 0.0 }
 0x1b3   :  { %593 = vmatmul.mubr.f32.vlgmr.msra.gmra.mrb[2].mxu0 %v211_v58 }
 0x286   :  { %v301_v2 = vpop.f32.mrb[2].mxu0 }
 0x287   :  { %v302_v3 = vadd.f32 %v489_v62, %v301_v2  ;;  %v594_v5 = vpop.f32.mrb[3].mxu0 }
 0x289   :  { %v305_v7 = vmax.f32 %v302_v3, 0.0 }
 0x28b   :  { %612 = vmatmul.mubr.msk.f32.vlgmr.msra.gmra.mrb[2].mxu1 %vm137_vm2, %v305_v7 }
 0x28c   :  { %675 = vmatpush3.bf16.msra.mxu1 %v674_v6  ;;  %622 = vmatprep.mubr.msk.f32.mxu1 %vm683_vm1, %v682_v0 }
 0x28d   :  { %676 = vmatprep.subr.bf16.mxu1 %v684_v4  ;;  %v492_v4 = vld [vmem:[%s918_s10] ss:$0 sm:$0xff] }
 0x290   :  { %678 = vmatpush3.bf16.msra.mxu1 %v677_v10 }
 0x35e   :  { %v390_v12 = vpop.f32.mrb[2].mxu1 }
 0x35f   :  { %v391_v13 = vadd.f32 %v490_v11, %v390_v12  ;;  %v613_v14 = vpop.f32.mrb[3].mxu1 }
 0x361   :  { %v394_v0 = vmax.f32 %v391_v13, 0.0 }
 0x363   :  { %623 = vmatmul.mubr.msk.f32.vlgmr.msra.gmra.mrb[4].mxu1 %vm406_vm3, %v394_v0 }
 0x436   :  { %v476_v15 = vpop.f32.mrb[4].mxu1 }
 0x437   :  { %v477_v16 = vadd.f32 %v492_v4, %v476_v15  ;;  %v624_v17 = vpop.f32.mrb[5].mxu1 }
 0x439   :  { %480 = vst [vmem:[%s919_s11] sm:$0xff] %v477_v16 }

</bundles_post_ra>
